<compile_context>
chip_gen: v6e
topology: v6e:2x2x1
jax: 0.10.0
libtpu: 0.0.40
codegen_flags: <defaults>
</compile_context>

<pallas_src>
import functools

import jax
import jax.numpy as jnp
from jax.experimental import pallas as pl
from jax.experimental.pallas import tpu as pltpu

LANE = 128      # TPU lane width: hidden feature dims are padded to multiples of this
SUBLANE = 8     # TPU sublane width: batch tiles / tiny output dims padded to this
OUT_PAD = 8     # output dim (2) is padded only to one sublane group, NOT to 128 lanes


def _round_up(n, m):
    return ((n + m - 1) // m) * m


def _num_tensorcores():
    """Best-effort TensorCores-per-chip (2 on v7x, 1 on v5e/v6e). Never raises."""
    try:
        info = pltpu.get_tpu_info()
        for name in ("num_cores", "core_count", "num_tensorcores",
                     "tensorcore_count", "cores_per_chip", "num_cores_per_chip"):
            n = getattr(info, name, None)
            if n is not None:
                return max(1, min(2, int(n)))
    except Exception:
        pass
    try:
        kind = jax.devices()[0].device_kind.lower()
        if "v7" in kind:
            return 2
    except Exception:
        pass
    return 1


_NUM_TC = _num_tensorcores()


def _mlp_kernel(x_ref, w1_ref, b1_ref, w2_ref, b2_ref, w3_ref, b3_ref, out_ref):
    # x arrives as f32 straight from HBM (no wrapper-side cast pass); cast to bf16 on
    # the VPU (huge slack here) so all matmuls run at native-bf16 MXU rate with f32
    # accumulation; bias add + ReLU are done in f32.
    x = x_ref[...].astype(jnp.bfloat16)                                          # (bb, Fin)
    h1 = jnp.dot(x, w1_ref[...], preferred_element_type=jnp.float32) + b1_ref[...]
    h1 = jnp.maximum(h1, 0.0).astype(jnp.bfloat16)                               # (bb, H1p)
    h2 = jnp.dot(h1, w2_ref[...], preferred_element_type=jnp.float32) + b2_ref[...]
    h2 = jnp.maximum(h2, 0.0).astype(jnp.bfloat16)                               # (bb, H2p)
    preds = jnp.dot(h2, w3_ref[...], preferred_element_type=jnp.float32) + b3_ref[...]
    out_ref[...] = preds.astype(out_ref.dtype)                                   # (bb, OUT_PAD) f32


def mlp_forward(x, w1, b1, w2, b2, w3, b3, *, block_b=1024):
    B, Fin = x.shape
    H1p = w1.shape[1]
    H2p = w2.shape[1]
    Fout_p = w3.shape[1]

    # ---- choose the batch tile / grid -------------------------------------------------
    B8 = _round_up(B, SUBLANE)
    bb = _round_up(min(block_b, B8), SUBLANE)
    # Megacore: only v7x has 2 TensorCores. Give each TC >= 2 pipelined steps when the
    # batch allows; on 1-TC chips never force a split (it's pure per-step overhead).
    min_steps = 2 * _NUM_TC if _NUM_TC > 1 else 1
    if min_steps > 1 and B8 >= min_steps * SUBLANE:
        bb = min(bb, _round_up(pl.cdiv(B8, min_steps), SUBLANE))
    n_steps = pl.cdiv(B8, bb)
    if _NUM_TC > 1 and n_steps > 1:
        n_steps = _round_up(n_steps, _NUM_TC)      # even split across the two TCs
    B_pad = n_steps * bb                           # whole tiles only -> no ragged block
    grid = (n_steps,)

    # x stays f32: the bf16 cast happens inside the kernel, which avoids a separate
    # wrapper-side XLA pass (f32 read + bf16 write + re-read) over x in HBM.
    x_p = x if B_pad == B else jnp.pad(x, ((0, B_pad - B), (0, 0)))

    # VMEM working set at block_b=1024: 2x x-tile (~256 KiB f32) + 2x out-tile (~64 KiB)
    # + resident weights (<64 KiB) ~= 0.4 MiB. Sized against the 32 MiB scoped default
    # (v7x has only 64 MiB physical VMEM) -- no vmem_limit_bytes needed.
    flops = 2 * B_pad * (Fin * H1p + H1p * H2p + H2p * Fout_p)
    bytes_accessed = (
        x_p.size * x_p.dtype.itemsize
        + sum(int(a.size) * a.dtype.itemsize for a in (w1, b1, w2, b2, w3, b3))
        + B_pad * Fout_p * 4
    )

    preds = pl.pallas_call(
        _mlp_kernel,
        out_shape=jax.ShapeDtypeStruct((B_pad, Fout_p), jnp.float32),
        grid_spec=pltpu.PrefetchScalarGridSpec(
            num_scalar_prefetch=0,
            grid=grid,
            in_specs=[
                pl.BlockSpec((bb, Fin), lambda i: (i, 0)),       # x tile (pipelined, f32)
                # Weights/biases: constant index_maps -> grid-invariant, fetched once and
                # resident in VMEM; footprint is tiny so default buffering is harmless.
                pl.BlockSpec((Fin, H1p), lambda i: (0, 0)),      # W1 (bf16)
                pl.BlockSpec((1, H1p), lambda i: (0, 0)),        # b1 (f32)
                pl.BlockSpec((H1p, H2p), lambda i: (0, 0)),      # W2
                pl.BlockSpec((1, H2p), lambda i: (0, 0)),        # b2
                pl.BlockSpec((H2p, Fout_p), lambda i: (0, 0)),   # W3 (only 8 cols wide)
                pl.BlockSpec((1, Fout_p), lambda i: (0, 0)),     # b3
            ],
            # Output is only OUT_PAD (=8) f32 lanes wide: legal because the block's last
            # dim equals the full array dim; cuts HBM writeback 16x vs 128-lane padding.
            out_specs=pl.BlockSpec((bb, Fout_p), lambda i: (i, 0)),
        ),
        compiler_params=pltpu.CompilerParams(
            dimension_semantics=("parallel",),
        ),
        cost_estimate=pl.CostEstimate(
            flops=flops, transcendentals=0, bytes_accessed=bytes_accessed
        ),
    )(x_p, w1, b1, w2, b2, w3, b3)
    return preds[:B]


@functools.partial(jax.jit, static_argnames=("out_dim", "block_b"))
def net_forward(x, padded_params, *, out_dim=2, block_b=1024):
    """Equivalent of Net.forward: run the fused MLP, split the (unpadded) output columns."""
    preds = mlp_forward(
        x,
        padded_params["w1"], padded_params["b1"],
        padded_params["w2"], padded_params["b2"],
        padded_params["w3"], padded_params["b3"],
        block_b=block_b,
    )
    slab = preds[:, :out_dim]          # single small slab copy of the real columns
    return slab[:, 0], slab[:, 1]      # (pred_ddG, pred_dS)


def init_params(key, in_dim, hidden1, hidden2, out_dim=2, dtype=jnp.float32):
    """Deterministic synthetic init (PyTorch-Linear-like uniform fan-in scaling), f32 logical."""
    ks = jax.random.split(key, 6)

    def lin(kw, kb, fin, fout):
        bound = 1.0 / jnp.sqrt(fin)
        w = jax.random.uniform(kw, (fin, fout), dtype, -bound, bound)
        b = jax.random.uniform(kb, (1, fout), dtype, -bound, bound)
        return w, b

    w1, b1 = lin(ks[0], ks[1], in_dim, hidden1)
    w2, b2 = lin(ks[2], ks[3], hidden1, hidden2)
    w3, b3 = lin(ks[4], ks[5], hidden2, out_dim)
    return {"w1": w1, "b1": b1, "w2": w2, "b2": b2, "w3": w3, "b3": b3}


def pad_params(p, lane=LANE):
    """One-time param prep: pad hidden dims to 128 lanes, the tiny output dim only to 8,
    cast weights to bf16 (matmul operands), keep biases f32 (bias/ReLU math is f32).

    Zero padding is exact: padded W1 columns give h1=ReLU(0+0)=0, which multiplies zero
    rows of W2, etc.; the extra output columns are zero and sliced away in net_forward.
    """
    def pad_axis(a, axis, target):
        extra = target - a.shape[axis]
        if extra == 0:
            return a
        widths = [(0, 0)] * a.ndim
        widths[axis] = (0, extra)
        return jnp.pad(a, widths)

    h1p = _round_up(p["w1"].shape[1], lane)
    h2p = _round_up(p["w2"].shape[1], lane)
    fop = _round_up(p["w3"].shape[1], OUT_PAD)     # 2 -> 8, NOT 128
    return {
        "w1": pad_axis(p["w1"], 1, h1p).astype(jnp.bfloat16),
        "b1": pad_axis(p["b1"], 1, h1p).astype(jnp.float32),
        "w2": pad_axis(pad_axis(p["w2"], 0, h1p), 1, h2p).astype(jnp.bfloat16),
        "b2": pad_axis(p["b2"], 1, h2p).astype(jnp.float32),
        "w3": pad_axis(pad_axis(p["w3"], 0, h2p), 1, fop).astype(jnp.bfloat16),
        "b3": pad_axis(p["b3"], 1, fop).astype(jnp.float32),
    }


def _reference_f32(x, p):
    h1 = jnp.maximum(x @ p["w1"] + p["b1"], 0.0)
    h2 = jnp.maximum(h1 @ p["w2"] + p["b2"], 0.0)
    preds = h2 @ p["w3"] + p["b3"]
    return preds[:, 0], preds[:, 1]


def _reference_bf16(x, pp):
    """Same numerics as the kernel: bf16 operands, f32 accumulation, f32 bias/ReLU."""
    xb = x.astype(jnp.bfloat16)
    h1 = jnp.maximum(jnp.dot(xb, pp["w1"], preferred_element_type=jnp.float32) + pp["b1"], 0.0)
    h1 = h1.astype(jnp.bfloat16)
    h2 = jnp.maximum(jnp.dot(h1, pp["w2"], preferred_element_type=jnp.float32) + pp["b2"], 0.0)
    h2 = h2.astype(jnp.bfloat16)
    preds = jnp.dot(h2, pp["w3"], preferred_element_type=jnp.float32) + pp["b3"]
    return preds[:, 0], preds[:, 1]


if __name__ == "__main__":
    key = jax.random.PRNGKey(0)
    k_x, k_p = jax.random.split(key)

    # Small latent-regression-sized MLP (output dim = 2).
    B, IN_DIM, H1, H2 = 64, 32, 64, 32
    x = jax.random.normal(k_x, (B, IN_DIM), jnp.float32)
    params = init_params(k_p, IN_DIM, H1, H2, out_dim=2)
    pparams = pad_params(params)

    pred_ddG, pred_dS = net_forward(x, pparams)
    jax.block_until_ready((pred_ddG, pred_dS))

    assert pred_ddG.shape == (B,) and pred_dS.shape == (B,)

    # Tight check against a reference with identical bf16-operand / f32-accumulate numerics.
    ref_ddG_b, ref_dS_b = _reference_bf16(x, pparams)
    assert jnp.allclose(pred_ddG, ref_ddG_b, atol=1e-3, rtol=1e-3)
    assert jnp.allclose(pred_dS, ref_dS_b, atol=1e-3, rtol=1e-3)

    # Loose sanity check against the full-f32 reference (bf16 operands -> ~1e-2 deviation).
    ref_ddG, ref_dS = _reference_f32(x, params)
    assert jnp.allclose(pred_ddG, ref_ddG, atol=5e-2, rtol=5e-2)
    assert jnp.allclose(pred_dS, ref_dS, atol=5e-2, rtol=5e-2)

    print("KERNEL_OK")
</pallas_src>

<mosaic_0001>
module attributes {stable_mosaic.version = 11 : i64} {
  func.func @_mlp_kernel(%arg0: i32, %arg1: memref<64x32xf32, #tpu.memory_space<vmem>>, %arg2: memref<32x128xbf16, #tpu.memory_space<vmem>>, %arg3: memref<1x128xf32, #tpu.memory_space<vmem>>, %arg4: memref<128x128xbf16, #tpu.memory_space<vmem>>, %arg5: memref<1x128xf32, #tpu.memory_space<vmem>>, %arg6: memref<128x8xbf16, #tpu.memory_space<vmem>>, %arg7: memref<1x8xf32, #tpu.memory_space<vmem>>, %arg8: memref<64x8xf32, #tpu.memory_space<vmem>>) attributes {dimension_semantics = [#tpu.dimension_semantics<parallel>], iteration_bounds = array<i64: 1>, scalar_prefetch = 0 : i64, scratch_operands = 0 : i64, tpu.core_type = #tpu.core_type<tc>, window_params = [{transform_indices = @transform_0, window_bounds = array<i64: 64, 32>}, {pipeline_mode = #tpu.pipeline_mode<synchronous>, transform_indices = @transform_1, window_bounds = array<i64: 32, 128>}, {pipeline_mode = #tpu.pipeline_mode<synchronous>, transform_indices = @transform_2, window_bounds = array<i64: 1, 128>}, {pipeline_mode = #tpu.pipeline_mode<synchronous>, transform_indices = @transform_3, window_bounds = array<i64: 128, 128>}, {pipeline_mode = #tpu.pipeline_mode<synchronous>, transform_indices = @transform_4, window_bounds = array<i64: 1, 128>}, {pipeline_mode = #tpu.pipeline_mode<synchronous>, transform_indices = @transform_5, window_bounds = array<i64: 128, 8>}, {pipeline_mode = #tpu.pipeline_mode<synchronous>, transform_indices = @transform_6, window_bounds = array<i64: 1, 8>}, {transform_indices = @transform_7, window_bounds = array<i64: 64, 8>}]} {
    %c0 = arith.constant 0 : index
    %c0_0 = arith.constant 0 : index
    %0 = vector.load %arg1[%c0, %c0_0] : memref<64x32xf32, #tpu.memory_space<vmem>>, vector<64x32xf32>
    %1 = arith.truncf %0 : vector<64x32xf32> to vector<64x32xbf16>
    %c0_1 = arith.constant 0 : index
    %c0_2 = arith.constant 0 : index
    %2 = vector.load %arg2[%c0_1, %c0_2] : memref<32x128xbf16, #tpu.memory_space<vmem>>, vector<32x128xbf16>
    %cst = arith.constant dense<0.000000e+00> : vector<64x128xf32>
    %3 = tpu.matmul %1, %2, %cst {dimension_numbers = #tpu.dot_dimension_numbers<[1], [0], [0], [1], [0, 0, 1, 1], [], []>} : vector<64x32xbf16>, vector<32x128xbf16>, vector<64x128xf32> -> vector<64x128xf32>
    %c0_3 = arith.constant 0 : index
    %c0_4 = arith.constant 0 : index
    %4 = vector.load %arg3[%c0_3, %c0_4] : memref<1x128xf32, #tpu.memory_space<vmem>>, vector<1x128xf32>
    %5 = vector.broadcast %4 : vector<1x128xf32> to vector<64x128xf32>
    %6 = arith.addf %3, %5 : vector<64x128xf32>
    %cst_5 = arith.constant 0.000000e+00 : f32
    %7 = vector.broadcast %cst_5 : f32 to vector<64x128xf32>
    %8 = arith.maximumf %6, %7 : vector<64x128xf32>
    %9 = arith.truncf %8 : vector<64x128xf32> to vector<64x128xbf16>
    %c0_6 = arith.constant 0 : index
    %c0_7 = arith.constant 0 : index
    %10 = vector.load %arg4[%c0_6, %c0_7] : memref<128x128xbf16, #tpu.memory_space<vmem>>, vector<128x128xbf16>
    %cst_8 = arith.constant dense<0.000000e+00> : vector<64x128xf32>
    %11 = tpu.matmul %9, %10, %cst_8 {dimension_numbers = #tpu.dot_dimension_numbers<[1], [0], [0], [1], [0, 0, 1, 1], [], []>} : vector<64x128xbf16>, vector<128x128xbf16>, vector<64x128xf32> -> vector<64x128xf32>
    %c0_9 = arith.constant 0 : index
    %c0_10 = arith.constant 0 : index
    %12 = vector.load %arg5[%c0_9, %c0_10] : memref<1x128xf32, #tpu.memory_space<vmem>>, vector<1x128xf32>
    %13 = vector.broadcast %12 : vector<1x128xf32> to vector<64x128xf32>
    %14 = arith.addf %11, %13 : vector<64x128xf32>
    %cst_11 = arith.constant 0.000000e+00 : f32
    %15 = vector.broadcast %cst_11 : f32 to vector<64x128xf32>
    %16 = arith.maximumf %14, %15 : vector<64x128xf32>
    %17 = arith.truncf %16 : vector<64x128xf32> to vector<64x128xbf16>
    %c0_12 = arith.constant 0 : index
    %c0_13 = arith.constant 0 : index
    %18 = vector.load %arg6[%c0_12, %c0_13] : memref<128x8xbf16, #tpu.memory_space<vmem>>, vector<128x8xbf16>
    %cst_14 = arith.constant dense<0.000000e+00> : vector<64x8xf32>
    %19 = tpu.matmul %17, %18, %cst_14 {dimension_numbers = #tpu.dot_dimension_numbers<[1], [0], [0], [1], [0, 0, 1, 1], [], []>} : vector<64x128xbf16>, vector<128x8xbf16>, vector<64x8xf32> -> vector<64x8xf32>
    %c0_15 = arith.constant 0 : index
    %c0_16 = arith.constant 0 : index
    %20 = vector.load %arg7[%c0_15, %c0_16] : memref<1x8xf32, #tpu.memory_space<vmem>>, vector<1x8xf32>
    %21 = vector.broadcast %20 : vector<1x8xf32> to vector<64x8xf32>
    %22 = arith.addf %19, %21 : vector<64x8xf32>
    %c0_17 = arith.constant 0 : index
    %c0_18 = arith.constant 0 : index
    %23 = vector.load %arg8[%c0_17, %c0_18] : memref<64x8xf32, #tpu.memory_space<vmem>>, vector<64x8xf32>
    tpu.vector_store %arg8[%c0_17, %c0_18], %22 {strides = array<i32>} : memref<64x8xf32, #tpu.memory_space<vmem>>, vector<64x8xf32>,
    return
  }
  func.func @transform_0(%arg0: i32) -> (i32, i32) {
    %c0_i32 = arith.constant 0 : i32
    %c0_i32_0 = arith.constant 0 : i32
    return %arg0, %c0_i32 : i32, i32
  }
  func.func @transform_1(%arg0: i32) -> (i32, i32) {
    %c0_i32 = arith.constant 0 : i32
    %c0_i32_0 = arith.constant 0 : i32
    %c0_i32_1 = arith.constant 0 : i32
    return %c0_i32, %c0_i32_0 : i32, i32
  }
  func.func @transform_2(%arg0: i32) -> (i32, i32) {
    %c0_i32 = arith.constant 0 : i32
    %c0_i32_0 = arith.constant 0 : i32
    %c0_i32_1 = arith.constant 0 : i32
    return %c0_i32, %c0_i32_0 : i32, i32
  }
  func.func @transform_3(%arg0: i32) -> (i32, i32) {
    %c0_i32 = arith.constant 0 : i32
    %c0_i32_0 = arith.constant 0 : i32
    %c0_i32_1 = arith.constant 0 : i32
    return %c0_i32, %c0_i32_0 : i32, i32
  }
  func.func @transform_4(%arg0: i32) -> (i32, i32) {
    %c0_i32 = arith.constant 0 : i32
    %c0_i32_0 = arith.constant 0 : i32
    %c0_i32_1 = arith.constant 0 : i32
    return %c0_i32, %c0_i32_0 : i32, i32
  }
  func.func @transform_5(%arg0: i32) -> (i32, i32) {
    %c0_i32 = arith.constant 0 : i32
    %c0_i32_0 = arith.constant 0 : i32
    %c0_i32_1 = arith.constant 0 : i32
    return %c0_i32, %c0_i32_0 : i32, i32
  }
  func.func @transform_6(%arg0: i32) -> (i32, i32) {
    %c0_i32 = arith.constant 0 : i32
    %c0_i32_0 = arith.constant 0 : i32
    %c0_i32_1 = arith.constant 0 : i32
    return %c0_i32, %c0_i32_0 : i32, i32
  }
  func.func @transform_7(%arg0: i32) -> (i32, i32) {
    %c0_i32 = arith.constant 0 : i32
    %c0_i32_0 = arith.constant 0 : i32
    return %arg0, %c0_i32 : i32, i32
  }
}

</mosaic_0001>

<bundles_post_ra>
// kernel: net_forward.1
= control target key start
LH: loop header
LB: loop body
LE: loop exit
PB: predicated region body
PF: predicated region fallthrough
CT: control target
= control target key end

     0   :  { %vm62_vm0 = vcmask 261120   ;;  %vm436_vm1 = vcmask 64512   ;;  %s745_s1 = inlined_call_operand.vmem [shape: bf16[32,128], index: 1, kind: input, shape index: {}]   ;;  %s746_s0 = inlined_call_operand.vmem [shape: f32[64,32], index: 0, kind: input, shape index: {}]   ;;  %s747_s3 = inlined_call_operand.vmem [shape: bf16[128,128], index: 3, kind: input, shape index: {}]   ;;  %s748_s5 = inlined_call_operand.vmem [shape: bf16[128,8], index: 5, kind: input, shape index: {}]   ;;  %s749_s2 = inlined_call_operand.vmem [shape: f32[1,128], index: 2, kind: input, shape index: {}]   ;;  %s750_s4 = inlined_call_operand.vmem [shape: f32[1,128], index: 4, kind: input, shape index: {}]   ;;  %s751_s6 = inlined_call_operand.vmem [shape: f32[1,8], index: 6, kind: input, shape index: {}]   ;;  %s752_s7 = inlined_call_operand.vmem [shape: f32[64,8], index: 7, kind: output, shape index: {}]  }
   0x1   :  { %v564_v0 = vld [vmem:[%s745_s1 + $0x8] sm:$0xff]   ;;  %v565_v1 = vld [vmem:[%s745_s1] sm:$0xff]   ;;  %v29_v5 = vld [vmem:[%s746_s0 + $0x10] sm:$0xff] }
   0x2   :  { %504 = vmatprep.subr.bf16.mxu0 %v564_v0  ;;  %v27_v2 = vld [vmem:[%s746_s0] sm:$0xff]  ;;  %v28_v3 = vld [vmem:[%s746_s0 + $0x8] sm:$0xff]  ;;  %v30_v6 = vld [vmem:[%s746_s0 + $0x18] sm:$0xff] }
   0x3   :  { %505 = vmatpush3.bf16.msra.mxu0 %v564_v0  ;;  %v35_v4 = vpack.c.bf16 %v28_v3, %v27_v2  ;;  %v31_v7 = vld [vmem:[%s746_s0 + $0x20] sm:$0xff]  ;;  %v32_v8 = vld [vmem:[%s746_s0 + $0x28] sm:$0xff]  ;;  %v566_v9 = vld [vmem:[%s747_s3 + $0x38] sm:$0xff]   ;;  %v36_v10 = vpack.c.bf16 %v30_v6, %v29_v5 }
   0x4   :  { %506 = vmatprep.subr.bf16.mxu0 %v565_v1  ;;  %v567_v11 = vld [vmem:[%s747_s3 + $0x30] sm:$0xff]   ;;  %v37_v12 = vpack.c.bf16 %v32_v8, %v31_v7  ;;  %516 = vmatprep.subr.bf16.mxu1 %v566_v9  ;;  %v568_v14 = vld [vmem:[%s747_s3 + $0x28] sm:$0xff]   ;;  %v34_v15 = vld [vmem:[%s746_s0 + $0x38] sm:$0xff] }
   0x5   :  { %508 = vmatprep.mubr.msk.bf16.mxu0 %vm62_vm0, %v35_v4  ;;  %517 = vmatpush3.bf16.msra.mxu1 %v566_v9  ;;  %v33_v13 = vld [vmem:[%s746_s0 + $0x30] sm:$0xff]  ;;  %v569_v16 = vld [vmem:[%s747_s3 + $0x20] sm:$0xff]   ;;  %v570_v18 = vld [vmem:[%s747_s3 + $0x18] sm:$0xff]  }
   0x6   :  { %518 = vmatprep.subr.bf16.mxu1 %v567_v11  ;;  %v38_v17 = vpack.c.bf16 %v34_v15, %v33_v13  ;;  %v571_v19 = vld [vmem:[%s747_s3 + $0x10] sm:$0xff]   ;;  %v572_v20 = vld [vmem:[%s747_s3 + $0x8] sm:$0xff]   ;;  %v573_v21 = vld [vmem:[%s747_s3] sm:$0xff]  }
   0x7   :  { %507 = vmatpush3.bf16.msra.mxu0 %v565_v1  ;;  %v574_v22 = vld [vmem:[%s748_s5 + $0x38] sm:$0xff]   ;;  %v575_v23 = vld [vmem:[%s748_s5 + $0x30] sm:$0xff]   ;;  %v576_v24 = vld [vmem:[%s748_s5 + $0x28] sm:$0xff]  }
   0x8   :  { %540 = vmatprep.subr.bf16.mxu0 %v574_v22  ;;  %v577_v25 = vld [vmem:[%s748_s5 + $0x20] sm:$0xff]   ;;  %v578_v26 = vld [vmem:[%s748_s5 + $0x18] sm:$0xff]   ;;  %v579_v56 = vld [vmem:[%s748_s5 + $0x10] sm:$0xff]  }
   0x9   :  { %519 = vmatpush3.bf16.msra.mxu1 %v567_v11  ;;  %v449_v29 = vld [vmem:[%s749_s2] ss:$0 sm:$0xff]  ;;  %v580_v57 = vld [vmem:[%s748_s5 + $0x8] sm:$0xff]  }
   0xa   :  { %509 = vmatmul.mubr.msk.bf16.vlgmr.msra.gmra.mxu0 %vm62_vm0, %v36_v10  ;;  %520 = vmatprep.subr.bf16.mxu1 %v568_v14  ;;  %v581_v58 = vld [vmem:[%s748_s5] sm:$0xff]  }
   0xb   :  { %512 = vmatprep.mubr.msk.bf16.mxu0 %vm62_vm0, %v37_v12  ;;  %541 = vmatpush3.bf16.msra.mxu0 %v574_v22  ;;  %v456_v61 = vld [vmem:[%s750_s4] ss:$0 sm:$0xff] }
   0xc   :  { %542 = vmatprep.subr.bf16.mxu0 %v575_v23 }
   0xd   :  { %521 = vmatpush3.bf16.msra.mxu1 %v568_v14 }
   0xe   :  { %522 = vmatprep.subr.bf16.mxu1 %v569_v16 }
   0xf   :  { %543 = vmatpush3.bf16.msra.mxu0 %v575_v23 }
  0x10   :  { %544 = vmatprep.subr.bf16.mxu0 %v576_v24 }
  0x11   :  { %523 = vmatpush3.bf16.msra.mxu1 %v569_v16 }
  0x12   :  { %513 = vmatmul.mubr.msk.bf16.gmra.mxu0 %vm62_vm0, %v38_v17  ;;  %524 = vmatprep.subr.bf16.mxu1 %v570_v18 }
  0x13   :  { %545 = vmatpush3.bf16.msra.mxu0 %v576_v24  ;;  %v465_v24 = vld [vmem:[%s751_s6] ss:$0 sm:$0xff] }
  0x14   :  { %546 = vmatprep.subr.bf16.mxu0 %v577_v25 }
  0x15   :  { %525 = vmatpush3.bf16.msra.mxu1 %v570_v18 }
  0x16   :  { %526 = vmatprep.subr.bf16.mxu1 %v571_v19 }
  0x17   :  { %547 = vmatpush3.bf16.msra.mxu0 %v577_v25 }
  0x18   :  { %548 = vmatprep.subr.bf16.mxu0 %v578_v26 }
  0x19   :  { %527 = vmatpush3.bf16.msra.mxu1 %v571_v19 }
  0x1a   :  { %528 = vmatprep.subr.bf16.mxu1 %v572_v20 }
  0x1b   :  { %549 = vmatpush3.bf16.msra.mxu0 %v578_v26 }
  0x1c   :  { %550 = vmatprep.subr.bf16.mxu0 %v579_v56 }
  0x1d   :  { %529 = vmatpush3.bf16.msra.mxu1 %v572_v20 }
  0x1e   :  { %530 = vmatprep.subr.bf16.mxu1 %v573_v21 }
  0x1f   :  { %551 = vmatpush3.bf16.msra.mxu0 %v579_v56 }
  0x20   :  { %552 = vmatprep.subr.bf16.mxu0 %v580_v57 }
  0x21   :  { %531 = vmatpush3.bf16.msra.mxu1 %v573_v21 }
  0x23   :  { %553 = vmatpush3.bf16.msra.mxu0 %v580_v57 }
  0x24   :  { %554 = vmatprep.subr.bf16.mxu0 %v581_v58 }
  0x27   :  { %555 = vmatpush3.bf16.msra.mxu0 %v581_v58 }
  0xca   :  { %v510_v27 = vpop.f32.mrf.mxu0 }
  0xcb   :  { %v118_v33 = vadd.f32 %v510_v27, %v449_v29 }
  0xcc   :  { %v109_v28 = vpop.f32.mrf.mxu0 }
  0xcd   :  { %v110_v31 = vadd.f32 %v449_v29, %v109_v28  ;;  %v142_v40 = vmax.f32 %v118_v33, 0.0 }
  0xce   :  { %v511_v30 = vpop.f32.mrf.mxu0 }
  0xcf   :  { %v121_v32 = vadd.f32 %v511_v30, %v449_v29  ;;  %v140_v38 = vmax.f32 %v110_v31, 0.0 }
  0xd0   :  { %v112_v34 = vpop.f32.mrf.mxu0 }
  0xd1   :  { %v113_v35 = vadd.f32 %v449_v29, %v112_v34  ;;  %v143_v36 = vmax.f32 %v121_v32, 0.0 }
  0xd2   :  { %v514_v37 = vpop.f32.mrf.mxu0 }
  0xd3   :  { %v141_v39 = vmax.f32 %v113_v35, 0.0  ;;  %v149_v43 = vpack.c.bf16 %v143_v36, %v142_v40  ;;  %v134_v47 = vadd.f32 %v514_v37, %v449_v29 }
  0xd4   :  { %v125_v41 = vpop.f32.mrf.mxu0 }
  0xd5   :  { %v148_v42 = vpack.c.bf16 %v141_v39, %v140_v38  ;;  %v126_v45 = vadd.f32 %v449_v29, %v125_v41  ;;  %v146_v53 = vmax.f32 %v134_v47, 0.0 }
  0xd6   :  { %v515_v44 = vpop.f32.mrf.mxu0 }
  0xd7   :  { %v137_v46 = vadd.f32 %v515_v44, %v449_v29  ;;  %532 = vmatprep.mubr.bf16.mxu1 %v148_v42  ;;  %v144_v51 = vmax.f32 %v126_v45, 0.0 }
  0xd8   :  { %v128_v48 = vpop.f32.mrf.mxu0  ;;  %533 = vmatmul.mubr.bf16.vlgmr.msra.gmra.mxu1 %v149_v43 }
  0xd9   :  { %v129_v49 = vadd.f32 %v449_v29, %v128_v48  ;;  %v147_v50 = vmax.f32 %v137_v46, 0.0 }
  0xdb   :  { %v145_v52 = vmax.f32 %v129_v49, 0.0  ;;  %v151_v55 = vpack.c.bf16 %v147_v50, %v146_v53 }
  0xdd   :  { %v150_v54 = vpack.c.bf16 %v145_v52, %v144_v51 }
  0xdf   :  { %536 = vmatprep.mubr.bf16.mxu1 %v150_v54 }
  0xe0   :  { %537 = vmatmul.mubr.bf16.gmra.mxu1 %v151_v55 }
 0x198   :  { %v534_v59 = vpop.f32.mrf.mxu1 }
 0x199   :  { %v266_v1 = vadd.f32 %v534_v59, %v456_v61 }
 0x19a   :  { %v257_v60 = vpop.f32.mrf.mxu1 }
 0x19b   :  { %v258_v63 = vadd.f32 %v456_v61, %v257_v60  ;;  %v290_v8 = vmax.f32 %v266_v1, 0.0 }
 0x19c   :  { %v535_v62 = vpop.f32.mrf.mxu1 }
 0x19d   :  { %v269_v0 = vadd.f32 %v535_v62, %v456_v61  ;;  %v288_v6 = vmax.f32 %v258_v63, 0.0 }
 0x19e   :  { %v260_v2 = vpop.f32.mrf.mxu1 }
 0x19f   :  { %v261_v3 = vadd.f32 %v456_v61, %v260_v2  ;;  %v291_v4 = vmax.f32 %v269_v0, 0.0 }
 0x1a0   :  { %v538_v5 = vpop.f32.mrf.mxu1 }
 0x1a1   :  { %v289_v7 = vmax.f32 %v261_v3, 0.0  ;;  %v297_v11 = vpack.c.bf16 %v291_v4, %v290_v8  ;;  %v282_v15 = vadd.f32 %v538_v5, %v456_v61 }
 0x1a2   :  { %v273_v9 = vpop.f32.mrf.mxu1 }
 0x1a3   :  { %v296_v10 = vpack.c.bf16 %v289_v7, %v288_v6  ;;  %v274_v13 = vadd.f32 %v456_v61, %v273_v9  ;;  %v294_v21 = vmax.f32 %v282_v15, 0.0 }
 0x1a4   :  { %v539_v12 = vpop.f32.mrf.mxu1 }
 0x1a5   :  { %v285_v14 = vadd.f32 %v539_v12, %v456_v61  ;;  %556 = vmatprep.mubr.bf16.mxu0 %v296_v10  ;;  %v292_v19 = vmax.f32 %v274_v13, 0.0 }
 0x1a6   :  { %v276_v16 = vpop.f32.mrf.mxu1  ;;  %557 = vmatmul.mubr.bf16.vlgmr.msra.gmra.mxu0 %v297_v11 }
 0x1a7   :  { %v277_v17 = vadd.f32 %v456_v61, %v276_v16  ;;  %v295_v18 = vmax.f32 %v285_v14, 0.0 }
 0x1a9   :  { %v293_v20 = vmax.f32 %v277_v17, 0.0  ;;  %v299_v23 = vpack.c.bf16 %v295_v18, %v294_v21 }
 0x1ab   :  { %v298_v22 = vpack.c.bf16 %v293_v20, %v292_v19 }
 0x1ad   :  { %560 = vmatprep.mubr.bf16.mxu0 %v298_v22 }
 0x1ae   :  { %561 = vmatmul.mubr.bf16.gmra.mxu0 %v299_v23 }
 0x266   :  { %v558_v25 = vpop.f32.mrf.mxu0 }
 0x267   :  { %v414_v26 = vadd.f32 %v558_v25, %v465_v24 }
 0x268   :  { %v405_v27 = vpop.f32.mrf.mxu0 }
 0x269   :  { %439 = vst.msk [vmem:[%s752_s7 + $0x10] sm:$0xff] %vm436_vm1, %v414_v26  ;;  %v406_v28 = vadd.f32 %v465_v24, %v405_v27 }
 0x26a   :  { %v559_v29 = vpop.f32.mrf.mxu0 }
 0x26b   :  { %437 = vst.msk [vmem:[%s752_s7] sm:$0xff] %vm436_vm1, %v406_v28  ;;  %v417_v30 = vadd.f32 %v559_v29, %v465_v24 }
 0x26c   :  { %v408_v31 = vpop.f32.mrf.mxu0 }
 0x26d   :  { %440 = vst.msk [vmem:[%s752_s7 + $0x18] sm:$0xff] %vm436_vm1, %v417_v30  ;;  %v409_v32 = vadd.f32 %v465_v24, %v408_v31 }
 0x26e   :  { %v562_v33 = vpop.f32.mrf.mxu0 }
 0x26f   :  { %438 = vst.msk [vmem:[%s752_s7 + $0x8] sm:$0xff] %vm436_vm1, %v409_v32  ;;  %v430_v34 = vadd.f32 %v562_v33, %v465_v24 }
 0x270   :  { %v421_v35 = vpop.f32.mrf.mxu0 }
 0x271   :  { %443 = vst.msk [vmem:[%s752_s7 + $0x30] sm:$0xff] %vm436_vm1, %v430_v34  ;;  %v422_v36 = vadd.f32 %v465_v24, %v421_v35 }
 0x272   :  { %v563_v37 = vpop.f32.mrf.mxu0 }
 0x273   :  { %441 = vst.msk [vmem:[%s752_s7 + $0x20] sm:$0xff] %vm436_vm1, %v422_v36  ;;  %v433_v38 = vadd.f32 %v563_v37, %v465_v24 }
 0x274   :  { %v424_v39 = vpop.f32.mrf.mxu0 }
 0x275   :  { %444 = vst.msk [vmem:[%s752_s7 + $0x38] sm:$0xff] %vm436_vm1, %v433_v38  ;;  %v425_v40 = vadd.f32 %v465_v24, %v424_v39 }
 0x277   :  { %442 = vst.msk [vmem:[%s752_s7 + $0x28] sm:$0xff] %vm436_vm1, %v425_v40 }

</bundles_post_ra>
